<compile_context>
chip_gen: v7x
topology: tpu7x:2x2x1
jax: 0.10.0
libtpu: 0.0.40
codegen_flags: <defaults>
</compile_context>

<pallas_src>
import math

import jax
import jax.numpy as jnp
from jax.experimental import pallas as pl
from jax.experimental.pallas import tpu as pltpu


def _round_up(x, m):
    return ((x + m - 1) // m) * m


def _vmem_capacity_bytes():
    """Physical VMEM per core; conservative 64 MiB fallback (v7x-safe)."""
    try:
        return int(pltpu.get_tpu_info().vmem_capacity_bytes)
    except Exception:
        return 64 * 1024 * 1024


# --------------------------------------------------------------------------- #
# Kernel
# --------------------------------------------------------------------------- #
def _ffn_kernel(x_ref, w1_ref, b1_ref, w2_ref, b2_ref, o_ref, acc_ref):
    """One (m, f) grid step of y = relu(x @ W1 + b1) @ W2 + b2.

    x_ref:  (TM, H)        -- resident across the f axis
    w1_ref: (1, H, TFF)    -- contiguous W1 slab for this f chunk
    b1_ref: (1, TFF)
    w2_ref: (TFF, H)
    b2_ref: (1, H)         -- resident
    o_ref:  (TM, H)
    acc_ref: (TM, H) f32 VMEM scratch accumulator
    """
    f = pl.program_id(1)
    nf = pl.num_programs(1)

    # First matmul chunk + bias + ReLU. (TM, TFF) f32 intermediate lives in VMEM.
    h = jnp.dot(x_ref[...], w1_ref[0], preferred_element_type=jnp.float32)
    h = jnp.maximum(h + b1_ref[...], 0.0)

    # This FF chunk's contribution to the (TM, H) output, f32.
    contrib = jnp.dot(h.astype(w2_ref.dtype), w2_ref[...],
                      preferred_element_type=jnp.float32)

    @pl.when(f == 0)
    def _():
        acc_ref[...] = jnp.zeros_like(acc_ref)

    @pl.when(f < nf - 1)
    def _():
        acc_ref[...] += contrib

    @pl.when(f == nf - 1)
    def _():
        # Fuse the last contribution + b2 straight into the output write.
        o_ref[...] = (acc_ref[...] + contrib + b2_ref[...]).astype(o_ref.dtype)


# --------------------------------------------------------------------------- #
# One-time parameter preparation (pad, cast, re-layout) -- do NOT call per step.
# --------------------------------------------------------------------------- #
def prepare_ffn_params(w1, b1, w2, b2, *, compute_dtype=jnp.bfloat16,
                       tff_target=512):
    """w1: (H, 4H), b1: (4H,), w2: (4H, H), b2: (H,).  Weights stored (in, out)."""
    H, F = w1.shape
    assert w2.shape == (F, H) and b1.shape == (F,) and b2.shape == (H,)

    # Pad H to a lane-dense multiple of 128 (exact: zero rows/cols contribute 0).
    H_pad = _round_up(H, 128)

    # FF-chunk size: largest multiple of 128 <= tff_target that divides F when
    # possible; otherwise pad F (also exact).
    if F % 128 == 0:
        TFF, t = 128, 128
        while t <= min(tff_target, F):
            if F % t == 0:
                TFF = t
            t += 128
    elif F < 128:
        TFF = F
    else:
        TFF = _round_up(min(tff_target, F), 128)
    F_pad = _round_up(F, TFF)

    def pad2(a, r, c):
        return jnp.pad(a, ((0, r - a.shape[0]), (0, c - a.shape[1]))) \
            if (r, c) != a.shape else a

    w1p = pad2(w1, H_pad, F_pad).astype(compute_dtype)
    w2p = pad2(w2, F_pad, H_pad).astype(compute_dtype)
    b1p = jnp.pad(b1, (0, F_pad - F)).reshape(1, F_pad).astype(jnp.float32)
    b2p = jnp.pad(b2, (0, H_pad - H)).reshape(1, H_pad).astype(jnp.float32)

    # Re-layout W1 so each f slab (H_pad, TFF) is one contiguous DMA region.
    w1_slabs = w1p.reshape(H_pad, F_pad // TFF, TFF).transpose(1, 0, 2)

    return dict(w1=w1_slabs, b1=b1p, w2=w2p, b2=b2p,
                H=H, H_pad=H_pad, F=F, F_pad=F_pad, TFF=TFF,
                compute_dtype=compute_dtype)


# --------------------------------------------------------------------------- #
# Wrapper
# --------------------------------------------------------------------------- #
def ffn_pallas(x, params, *, tm_target=1024, vmem_fraction=0.8):
    """x: (..., H) -> (..., H)."""
    H = params["H"]
    H_pad = params["H_pad"]
    F_pad = params["F_pad"]
    TFF = params["TFF"]
    cdt = params["compute_dtype"]
    assert x.shape[-1] == H

    lead = x.shape[:-1]
    M = int(math.prod(lead)) if lead else 1
    out_dtype = x.dtype
    x2d = x.reshape(M, H)

    elt = jnp.dtype(cdt).itemsize
    out_elt = jnp.dtype(out_dtype).itemsize

    # ---- M tile size ------------------------------------------------------
    TM = min(tm_target, _round_up(M, 8))
    # v7x has 2 TensorCores: make sure the "parallel" m axis has >= 2 blocks.
    if M >= 16 and _round_up(M, TM) // TM < 2:
        TM = _round_up((M + 1) // 2, 8)

    # VMEM estimate: double-buffered blocks + accumulator + h intermediate
    # (f32 + compute-dtype cast copy) + per-step f32 contribution.
    def vmem_est(tm):
        return (2 * (tm * H_pad * elt            # x tile
                     + H_pad * TFF * elt          # W1 slab
                     + TFF * H_pad * elt          # W2 slab
                     + 8 * TFF * 4                # b1 chunk (sublane-padded)
                     + tm * H_pad * out_elt)      # out tile
                + 8 * H_pad * 4                   # b2 (resident)
                + tm * H_pad * 4                  # f32 accumulator scratch
                + tm * H_pad * 4                  # per-step contribution
                + tm * TFF * (4 + elt))           # h intermediate + cast copy

    cap = _vmem_capacity_bytes()
    budget = int(cap * vmem_fraction)
    while vmem_est(TM) > budget and TM > 256:
        TM = max(256, _round_up(TM // 2, 8))

    M_pad = _round_up(M, TM)

    # ---- Pad / cast activations (exact) ------------------------------------
    if H_pad != H:
        x2d = jnp.pad(x2d, ((0, 0), (0, H_pad - H)))
    if M_pad != M:
        x2d = jnp.pad(x2d, ((0, M_pad - M), (0, 0)))
    x2d = x2d.astype(cdt)

    grid = (M_pad // TM, F_pad // TFF)
    num_m = grid[0]

    vmem_limit = int(min(int(cap * 0.9),
                         max(32 * 1024 * 1024, int(1.25 * vmem_est(TM)))))

    cost = pl.CostEstimate(
        flops=int(2 * M_pad * F_pad * H_pad * 2),
        transcendentals=0,
        bytes_accessed=int(M_pad * H_pad * elt                       # x read
                           + M_pad * H_pad * out_elt                 # out write
                           + num_m * 2 * H_pad * F_pad * elt         # W1+W2 per m pass
                           + F_pad * 4 + H_pad * 4),                 # biases
    )

    out = pl.pallas_call(
        _ffn_kernel,
        out_shape=jax.ShapeDtypeStruct((M_pad, H_pad), out_dtype),
        grid_spec=pltpu.PrefetchScalarGridSpec(
            num_scalar_prefetch=0,
            grid=grid,
            in_specs=[
                pl.BlockSpec((TM, H_pad), lambda m, f: (m, 0)),         # x tile
                pl.BlockSpec((1, H_pad, TFF), lambda m, f: (f, 0, 0)),  # W1 slab (contiguous)
                pl.BlockSpec((1, TFF), lambda m, f: (0, f)),            # b1 chunk
                pl.BlockSpec((TFF, H_pad), lambda m, f: (f, 0)),        # W2 slab (row-contig)
                pl.BlockSpec((1, H_pad), lambda m, f: (0, 0)),          # b2 (resident)
            ],
            out_specs=pl.BlockSpec((TM, H_pad), lambda m, f: (m, 0)),
            scratch_shapes=[pltpu.VMEM((TM, H_pad), jnp.float32)],
        ),
        compiler_params=pltpu.CompilerParams(
            dimension_semantics=("parallel", "arbitrary"),
            vmem_limit_bytes=vmem_limit,
        ),
        cost_estimate=cost,
    )(x2d, params["w1"], params["b1"], params["w2"], params["b2"])

    out = out[:M, :H]
    return out.reshape(*lead, H)


def ffn_reference(x, w1, b1, w2, b2):
    h = jnp.maximum(x @ w1 + b1, 0.0)
    return h @ w2 + b2


if __name__ == "__main__":
    # Small shapes consistent with the module: batch=2, seq=8, hidden=32.
    B, S, H = 2, 8, 32
    key = jax.random.PRNGKey(0)
    kx, kw1, kb1, kw2, kb2 = jax.random.split(key, 5)

    x = jax.random.normal(kx, (B, S, H), dtype=jnp.float32)

    # nn.Linear-style init: U(-1/sqrt(fan_in), 1/sqrt(fan_in)); weights stored
    # (in, out) so the kernel computes x @ W (== PyTorch's x @ W.T).
    bound1 = 1.0 / jnp.sqrt(H)
    w1 = jax.random.uniform(kw1, (H, 4 * H), minval=-bound1, maxval=bound1, dtype=jnp.float32)
    b1 = jax.random.uniform(kb1, (4 * H,), minval=-bound1, maxval=bound1, dtype=jnp.float32)
    bound2 = 1.0 / jnp.sqrt(4 * H)
    w2 = jax.random.uniform(kw2, (4 * H, H), minval=-bound2, maxval=bound2, dtype=jnp.float32)
    b2 = jax.random.uniform(kb2, (H,), minval=-bound2, maxval=bound2, dtype=jnp.float32)

    y_ref = ffn_reference(x, w1, b1, w2, b2)

    # Exact f32 path (tight tolerance). Params prepared ONCE and reused.
    params_f32 = prepare_ffn_params(w1, b1, w2, b2, compute_dtype=jnp.float32)
    y_f32 = ffn_pallas(x, params_f32)
    jax.block_until_ready(y_f32)
    assert y_f32.shape == (B, S, H)
    assert jnp.allclose(y_f32, y_ref, atol=1e-5, rtol=1e-5), "f32 mismatch vs reference"

    # bf16 MXU-operand path (weights persisted in bf16 once; f32 accumulation).
    params_bf16 = prepare_ffn_params(w1, b1, w2, b2, compute_dtype=jnp.bfloat16)
    y_bf16 = ffn_pallas(x, params_bf16)
    jax.block_until_ready(y_bf16)
    assert y_bf16.shape == (B, S, H)
    assert jnp.allclose(y_bf16, y_ref, atol=3e-2, rtol=3e-2), "bf16 mismatch vs reference"

    print("KERNEL_OK")
</pallas_src>

<mosaic_0001>
module attributes {stable_mosaic.version = 11 : i64} {
  func.func @_ffn_kernel(%arg0: i32, %arg1: i32, %arg2: memref<8x128xf32, #tpu.memory_space<vmem>>, %arg3: memref<1x128x128xf32, #tpu.memory_space<vmem>>, %arg4: memref<1x128xf32, #tpu.memory_space<vmem>>, %arg5: memref<128x128xf32, #tpu.memory_space<vmem>>, %arg6: memref<1x128xf32, #tpu.memory_space<vmem>>, %arg7: memref<8x128xf32, #tpu.memory_space<vmem>>, %arg8: memref<8x128xf32, #tpu.memory_space<vmem>>) attributes {dimension_semantics = [#tpu.dimension_semantics<parallel>, #tpu.dimension_semantics<arbitrary>], iteration_bounds = array<i64: 2, 1>, scalar_prefetch = 0 : i64, scratch_operands = 1 : i64, tpu.core_type = #tpu.core_type<tc>, window_params = [{transform_indices = @transform_0, window_bounds = array<i64: 8, 128>}, {transform_indices = @transform_1, window_bounds = array<i64: 1, 128, 128>}, {transform_indices = @transform_2, window_bounds = array<i64: 1, 128>}, {transform_indices = @transform_3, window_bounds = array<i64: 128, 128>}, {pipeline_mode = #tpu.pipeline_mode<synchronous>, transform_indices = @transform_4, window_bounds = array<i64: 1, 128>}, {transform_indices = @transform_5, window_bounds = array<i64: 8, 128>}]} {
    %c0 = arith.constant 0 : index
    %c0_0 = arith.constant 0 : index
    %0 = vector.load %arg2[%c0, %c0_0] : memref<8x128xf32, #tpu.memory_space<vmem>>, vector<8x128xf32>
    %c0_1 = arith.constant 0 : index
    %c0_2 = arith.constant 0 : index
    %c0_3 = arith.constant 0 : index
    %1 = vector.load %arg3[%c0_1, %c0_2, %c0_3] : memref<1x128x128xf32, #tpu.memory_space<vmem>>, vector<1x128x128xf32>
    %2 = vector.shape_cast %1 : vector<1x128x128xf32> to vector<128x128xf32>
    %cst = arith.constant dense<0.000000e+00> : vector<8x128xf32>
    %3 = tpu.matmul %0, %2, %cst {dimension_numbers = #tpu.dot_dimension_numbers<[1], [0], [0], [1], [0, 0, 1, 1], [], []>} : vector<8x128xf32>, vector<128x128xf32>, vector<8x128xf32> -> vector<8x128xf32>
    %c0_4 = arith.constant 0 : index
    %c0_5 = arith.constant 0 : index
    %4 = vector.load %arg4[%c0_4, %c0_5] : memref<1x128xf32, #tpu.memory_space<vmem>>, vector<1x128xf32>
    %5 = vector.broadcast %4 : vector<1x128xf32> to vector<8x128xf32>
    %6 = arith.addf %3, %5 : vector<8x128xf32>
    %cst_6 = arith.constant 0.000000e+00 : f32
    %7 = vector.broadcast %cst_6 : f32 to vector<8x128xf32>
    %8 = arith.maximumf %6, %7 : vector<8x128xf32>
    %c0_7 = arith.constant 0 : index
    %c0_8 = arith.constant 0 : index
    %9 = vector.load %arg5[%c0_7, %c0_8] : memref<128x128xf32, #tpu.memory_space<vmem>>, vector<128x128xf32>
    %cst_9 = arith.constant dense<0.000000e+00> : vector<8x128xf32>
    %10 = tpu.matmul %8, %9, %cst_9 {dimension_numbers = #tpu.dot_dimension_numbers<[1], [0], [0], [1], [0, 0, 1, 1], [], []>} : vector<8x128xf32>, vector<128x128xf32>, vector<8x128xf32> -> vector<8x128xf32>
    %c0_i32 = arith.constant 0 : i32
    %11 = arith.cmpi eq, %arg1, %c0_i32 : i32
    %12 = arith.extui %11 : i1 to i32
    %c0_i32_10 = arith.constant 0 : i32
    %13 = arith.cmpi ne, %12, %c0_i32_10 : i32
    scf.if %13 {
      %cst_15 = arith.constant 0.000000e+00 : f32
      %20 = vector.broadcast %cst_15 : f32 to vector<8x128xf32>
      %c0_16 = arith.constant 0 : index
      %c0_17 = arith.constant 0 : index
      %21 = vector.load %arg8[%c0_16, %c0_17] : memref<8x128xf32, #tpu.memory_space<vmem>>, vector<8x128xf32>
      tpu.vector_store %arg8[%c0_16, %c0_17], %20 {strides = array<i32>} : memref<8x128xf32, #tpu.memory_space<vmem>>, vector<8x128xf32>,
    } else {
    }
    %c0_i32_11 = arith.constant 0 : i32
    %14 = arith.cmpi slt, %arg1, %c0_i32_11 : i32
    %15 = arith.extui %14 : i1 to i32
    %c0_i32_12 = arith.constant 0 : i32
    %16 = arith.cmpi ne, %15, %c0_i32_12 : i32
    scf.if %16 {
      %c0_15 = arith.constant 0 : index
      %c0_16 = arith.constant 0 : index
      %20 = vector.load %arg8[%c0_15, %c0_16] : memref<8x128xf32, #tpu.memory_space<vmem>>, vector<8x128xf32>
      %21 = arith.addf %20, %10 : vector<8x128xf32>
      %c0_17 = arith.constant 0 : index
      %c0_18 = arith.constant 0 : index
      %22 = vector.load %arg8[%c0_17, %c0_18] : memref<8x128xf32, #tpu.memory_space<vmem>>, vector<8x128xf32>
      tpu.vector_store %arg8[%c0_17, %c0_18], %21 {strides = array<i32>} : memref<8x128xf32, #tpu.memory_space<vmem>>, vector<8x128xf32>,
    } else {
    }
    %c0_i32_13 = arith.constant 0 : i32
    %17 = arith.cmpi eq, %arg1, %c0_i32_13 : i32
    %18 = arith.extui %17 : i1 to i32
    %c0_i32_14 = arith.constant 0 : i32
    %19 = arith.cmpi ne, %18, %c0_i32_14 : i32
    scf.if %19 {
      %c0_15 = arith.constant 0 : index
      %c0_16 = arith.constant 0 : index
      %20 = vector.load %arg8[%c0_15, %c0_16] : memref<8x128xf32, #tpu.memory_space<vmem>>, vector<8x128xf32>
      %21 = arith.addf %20, %10 : vector<8x128xf32>
      %c0_17 = arith.constant 0 : index
      %c0_18 = arith.constant 0 : index
      %22 = vector.load %arg6[%c0_17, %c0_18] : memref<1x128xf32, #tpu.memory_space<vmem>>, vector<1x128xf32>
      %23 = vector.broadcast %22 : vector<1x128xf32> to vector<8x128xf32>
      %24 = arith.addf %21, %23 : vector<8x128xf32>
      %c0_19 = arith.constant 0 : index
      %c0_20 = arith.constant 0 : index
      %25 = vector.load %arg7[%c0_19, %c0_20] : memref<8x128xf32, #tpu.memory_space<vmem>>, vector<8x128xf32>
      tpu.vector_store %arg7[%c0_19, %c0_20], %24 {strides = array<i32>} : memref<8x128xf32, #tpu.memory_space<vmem>>, vector<8x128xf32>,
    } else {
    }
    return
  }
  func.func @transform_0(%arg0: i32, %arg1: i32) -> (i32, i32) {
    %c0_i32 = arith.constant 0 : i32
    %c0_i32_0 = arith.constant 0 : i32
    return %arg0, %c0_i32 : i32, i32
  }
  func.func @transform_1(%arg0: i32, %arg1: i32) -> (i32, i32, i32) {
    %c0_i32 = arith.constant 0 : i32
    %c0_i32_0 = arith.constant 0 : i32
    %c0_i32_1 = arith.constant 0 : i32
    return %arg1, %c0_i32, %c0_i32_0 : i32, i32, i32
  }
  func.func @transform_2(%arg0: i32, %arg1: i32) -> (i32, i32) {
    %c0_i32 = arith.constant 0 : i32
    %c0_i32_0 = arith.constant 0 : i32
    return %c0_i32, %arg1 : i32, i32
  }
  func.func @transform_3(%arg0: i32, %arg1: i32) -> (i32, i32) {
    %c0_i32 = arith.constant 0 : i32
    %c0_i32_0 = arith.constant 0 : i32
    return %arg1, %c0_i32 : i32, i32
  }
  func.func @transform_4(%arg0: i32, %arg1: i32) -> (i32, i32) {
    %c0_i32 = arith.constant 0 : i32
    %c0_i32_0 = arith.constant 0 : i32
    %c0_i32_1 = arith.constant 0 : i32
    return %c0_i32, %c0_i32_0 : i32, i32
  }
  func.func @transform_5(%arg0: i32, %arg1: i32) -> (i32, i32) {
    %c0_i32 = arith.constant 0 : i32
    %c0_i32_0 = arith.constant 0 : i32
    return %arg0, %c0_i32 : i32, i32
  }
}

</mosaic_0001>

<bundles_post_ra>
// kernel: tpu_custom_call.1
= control target key start
LH: loop header
LB: loop body
LE: loop exit
PB: predicated region body
PF: predicated region fallthrough
CT: control target
= control target key end

     0   :  { %10 = vsyncpa [#allocation4], 0  ;;  %s1398_s0 = inlined_call_operand.hbm [shape: f32[16,128], index: 0, kind: input, shape index: {}]   ;;  %s1399_s1 = inlined_call_operand.hbm [shape: f32[1,128,128], index: 1, kind: input, shape index: {}]   ;;  %s1400_s2 = inlined_call_operand.vmem [shape: f32[1,128], index: 2, kind: input, shape index: {}]   ;;  %s1401_s3 = inlined_call_operand.hbm [shape: f32[128,128], index: 3, kind: input, shape index: {}]   ;;  %s1402_s4 = inlined_call_operand.vmem [shape: f32[1,128], index: 4, kind: input, shape index: {}]   ;;  %s1403_s5 = inlined_call_operand.hbm [shape: f32[16,128], index: 5, kind: output, shape index: {}]  }
   0x1   :  { %12 = vsyncpa [#allocation4 + $0x1], 0 }
   0x2   :  { %13 = vsyncpa [#allocation7], 0 }
   0x3   :  { %14 = vsyncpa [#allocation5], 0 }
   0x4   :  { %16 = vsyncpa [#allocation5 + $0x1], 0  ;;  %s1119_s18 = smov 0   ;;  %s1121_s19 = smov 0  }
   0x5   :  { %s1123_s20 = smov 0   ;;  %s1125_s21 = smov 0  }
   0x6   :  { %s1127_s22 = smov 0   ;;  %s1129_s23 = smov 0  }
   0x7 LB: > { %s646_s24 = sadd.s32 4294967295, %s1078_s23   ;;  %s647_s25 = sadd.s32 4294967294, %s1078_s23   ;;  %s1078_s23 = sphi %s1129_s23, %s22_s23   ;;  %s1074_s22 = sphi %s1127_s22, %s1425_s22   ;;  %s1070_s21 = sphi %s1125_s21, %s1424_s21   ;;  %s1066_s20 = sphi %s1123_s20, %s1423_s20   ;;  %s1062_s19 = sphi %s1121_s19, %s1422_s19   ;;  %s1058_s18 = sphi %s1119_s18, %s1421_s18  }
   0x8   : > { %p54_p0 = scmp.ne.s32.totalorder %s1062_s19, %s1058_s18  ;;  %p1153_p1 = scmp.eq.s32.totalorder %s646_s24, 0 }
   0x9   : > { %p1157_p2 = scmp.eq.s32.totalorder %s646_s24, 1  ;;  %p183_p3 = scmp.eq.s32.totalorder %s647_s25, 1 }
   0xa   : > { %s1408_s26 = scalar_select %p1153_p1, 1, 0 }
   0xb   : > { %p1163_p4 = por %p1153_p1, %p54_p0  ;;  %p648_p5 = scmp.ge.s32.totalorder %s1078_s23, 1 }
   0xc   : > { %p1168_p6 = por %p183_p3, %p54_p0  ;;  %p190_p7 = scmp.lt.s32.totalorder %s1078_s23, 3 }
   0xd   : > { %s1410_s28 = scalar_select %p1163_p4, 1, 0 }
   0xe   : > { %s1411_s29 = scalar_select %p1168_p6, 1, 0 }
   0xf   : > { %p1173_p8 = pnand %p648_p5, %p190_p7  ;;  %s1080_s6 = smov [#allocation6]  }
  0x10   : > { %s205_s7 = sshll.u32 %s1080_s6, 4  ;;  %s1081_s9 = smov [#allocation8]   ;;  %s1177_s7 = int_to_ptr.vmem [resolvable:$true] %s205_s7 }
  0x11   : > { %p830_p9 = pneg %p1173_p8  ;;  %s227_s10 = sshll.u32 %s1081_s9, 4  ;;  %s1188_s10 = int_to_ptr.vmem [resolvable:$true] %s227_s10 }
  0x12   : > { %s906_s13 = scalar_lea.hbm %s1399_s1, 2048 }
  0x13   : > { %p1184_p11 = pnand %p830_p9, %p1153_p1  ;;  %p907_p12 = scmp.ne.s32.totalorder %s1399_s1, %s906_s13 }
  0x14   : > { %p913_p5 = scmp.lt.u32.totalorder %s906_s13, %s1399_s1 }
  0x15   : > { %p908_p13 = pneg %p1184_p11 }
  0x17   : > { %p909_p0 = pnand %p908_p13, %p907_p12 }
  0x19   : > { %p910_p3 = pneg %p909_p0 }
  0x1b   : > { %p915_p7 = pnand %p913_p5, %p910_p3 }
  0x1d   : > { %918 = shalt.err (!%p915_p7)
}
  0x1e   : > { %s919_s24 = scalar_lea.vmem %s1177_s7, 2048  ;;  %p927_p1 = scmp.lt.s32.totalorder %s1177_s7, %s1177_s7 }
  0x1f   : > { %p920_p9 = scmp.ne.s32.totalorder %s1177_s7, %s919_s24  ;;  %p928_p12 = scmp.lt.s32.totalorder %s919_s24, %s919_s24 }
  0x21   : > { %p922_p10 = pnand %p920_p9, %p908_p13  ;;  %p929_p0 = por %p928_p12, %p927_p1 }
  0x23   : > { %p923_p6 = pneg %p922_p10 }
  0x25   : > { %p930_p4 = pnand %p929_p0, %p923_p6 }
  0x27   : > { %933 = shalt.err (!%p930_p4)
}
  0x28   : > { %s1082_s25 = smov 128   ;;  %s1083_s6 = smov 8  }
  0x29   : > { %833 = dma.hbm_to_vmem [thread:$0]  (!%p1184_p11), %s1399_s1, 2048, %s1177_s7, [#allocation7], %s1082_s25, %s1082_s25, %s1083_s6  }
  0x2a   : > { %s934_s14 = scalar_lea.hbm %s1401_s3, 2048 }
  0x2b   : > { %p935_p1 = scmp.ne.s32.totalorder %s1401_s3, %s934_s14  ;;  %p941_p10 = scmp.lt.u32.totalorder %s934_s14, %s1401_s3 }
  0x2d   : > { %p937_p4 = pnand %p935_p1, %p908_p13 }
  0x2f   : > { %p938_p6 = pneg %p937_p4 }
  0x31   : > { %p943_p3 = pnand %p941_p10, %p938_p6 }
  0x33   : > { %946 = shalt.err (!%p943_p3)
}
  0x34   : > { %s947_s7 = scalar_lea.vmem %s1188_s10, 2048  ;;  %p955_p12 = scmp.lt.s32.totalorder %s1188_s10, %s1188_s10 }
  0x35   : > { %p948_p5 = scmp.ne.s32.totalorder %s1188_s10, %s947_s7  ;;  %p956_p0 = scmp.lt.s32.totalorder %s947_s7, %s947_s7 }
  0x37   : > { %p950_p7 = pnand %p948_p5, %p908_p13  ;;  %p957_p1 = por %p956_p0, %p955_p12 }
  0x39   : > { %p951_p9 = pneg %p950_p7 }
  0x3b   : > { %p958_p4 = pnand %p957_p1, %p951_p9 }
  0x3d   : > { %961 = shalt.err (!%p958_p4)
}
  0x3e   : > { %836 = dma.hbm_to_vmem [thread:$0]  (!%p1184_p11), %s1401_s3, 2048, %s1188_s10, [#allocation7], %s1082_s25, %s1082_s25, %s1083_s6  }
  0x3f   : > { %s34_s12 = sadd.s32 1, %s1074_s22  ;;  %s41_s13 = sadd.s32 1, %s1066_s20 }
  0x40   : > { %p36_p13 = scmp.ge.s32.totalorder %s34_s12, 2  ;;  %p48_p6 = scmp.ne.s32.totalorder %s1066_s20, %s1062_s19 }
  0x41   : > { %p49_p10 = scmp.eq.s32.totalorder %s1078_s23, 0  ;;  %p847_p3 = scmp.lt.s32.totalorder %s1078_s23, 2 }
  0x42   : > { %s1427_s12 = smov (%p36_p13, %s34_s12), 0  ;;  %p1252_p7 = por %p1157_p2, %p48_p6 }
  0x43   : > { %p50_p5 = por %p49_p10, %p48_p6  ;;  %s38_s14 = ssub.s32 %s1074_s22, %s1427_s12 }
  0x44   : > { %s1414_s8 = scalar_select %p1252_p7, 1, 0 }
  0x45   : > { %s244_s15 = sand.u32 1, %s1066_s20   ;;  %p39_p9 = scmp.eq.s32.totalorder %s38_s14, 0 }
  0x46   : > { %s653_s10 = sshll.u32 %s244_s15, 3  ;;  %s654_s25 = sshll.u32 %s1074_s22, 7 }
  0x47   : > { %s1261_s6 = scalar_select %p39_p9, %s1066_s20, %s41_s13  }
  0x48   : > { %s1266_s24 = scalar_lea.hbm %s1398_s0, %s654_s25  ;;  %s248_s27 = scalar_lea.vmem [#allocation3], %s653_s10 }
  0x49   : > { %s255_s7 = sshll.u32 %s248_s27, 4  ;;  %p1270_p2 = pnand %p847_p3, %p50_p5  ;;  %s1274_s7 = int_to_ptr.vmem [resolvable:$true] %s255_s7 }
  0x4a   : > { %s245_s11 = scalar_lea.sflag [#allocation4], %s244_s15  ;;  %s962_s13 = scalar_lea.hbm %s1266_s24, 128 }
  0x4b   : > { %p963_p11 = scmp.ne.s32.totalorder %s1266_s24, %s962_s13  ;;  %p964_p12 = pneg %p1270_p2 }
  0x4c   : > { %s967_s25 = scalar_lea.hbm %s1398_s0, 256  ;;  %p968_p4 = scmp.lt.u32.totalorder %s1266_s24, %s1398_s0 }
  0x4d   : > { %p965_p0 = pnand %p964_p12, %p963_p11  ;;  %p969_p13 = scmp.lt.u32.totalorder %s967_s25, %s962_s13 }
  0x4e   : > { %p971_p10 = scmp.lt.u32.totalorder %s962_s13, %s1266_s24 }
  0x4f   : > { %p966_p1 = pneg %p965_p0  ;;  %p970_p6 = por %p969_p13, %p968_p4 }
  0x51   : > { %p972_p3 = por %p971_p10, %p970_p6 }
  0x53   : > { %p973_p5 = pnand %p972_p3, %p966_p1 }
  0x55   : > { %976 = shalt.err (!%p973_p5)
}
  0x56   : > { %s977_s15 = scalar_lea.vmem %s1274_s7, 128  ;;  %s1084_s27 = smov [#allocation3]  }
  0x57   : > { %p978_p9 = scmp.ne.s32.totalorder %s1274_s7, %s977_s15  ;;  %s982_s14 = sshll.u32 %s1084_s27, 4  ;;  %s983_s14 = int_to_ptr.vmem [resolvable:$false] %s982_s14 }
  0x58   : > { %s984_s10 = scalar_lea.vmem %s983_s14, 256  ;;  %p985_p7 = scmp.lt.s32.totalorder %s1274_s7, %s983_s14 }
  0x59   : > { %p980_p11 = pnand %p978_p9, %p964_p12  ;;  %p986_p4 = scmp.lt.s32.totalorder %s984_s10, %s977_s15 }
  0x5b   : > { %p981_p0 = pneg %p980_p11  ;;  %p987_p13 = por %p986_p4, %p985_p7 }
  0x5d   : > { %p988_p6 = pnand %p987_p13, %p981_p0 }
  0x5f   : > { %991 = shalt.err (!%p988_p6)
}
  0x60   : > { %840 = dma.hbm_to_vmem [thread:$0]  (!%p1270_p2), %s1266_s24, 128, %s1274_s7, %s245_s11  }
  0x61   : > { %264 = sbr.rel (%p1173_p8) target bundleno = 587 (0x24b), region = 40  ;;  %s1304_s13 = sand.u32 (!%p1173_p8), 1, %s1062_s19  }
  0x62   : > { %s656_s25 = sshll.u32 (!%p1173_p8), %s1304_s13, 3  ;;  %s267_s16 = scalar_lea.sflag (!%p1173_p8), [#allocation4], %s1304_s13 }
  0x63   : > { %s1310_s17 = scalar_lea.vmem (!%p1173_p8), [#allocation3], %s656_s25  ;;  %p1416_p7 = scmp.ne.s32.totalorder (!%p1173_p8), %s1410_s28, 0 }
  0x68   : > { %1045 = dma.done.wait (%p1416_p7), %s267_s16, 128  }
  0x69   : > { %1047 = vsyncadd (%p1416_p7), %s267_s16, 4294967168  ;;  %p1417_p2 = scmp.ne.s32.totalorder %s1408_s26, 0 }
  0x6b   : > { %1049 = dma.done.wait (%p1417_p2), [#allocation7], 4096  }
  0x6c   : > { %1051 = vsyncadd (%p1417_p2), [#allocation7], 4294963200  ;;  %v1085_v0 = vmov 0.0|0.0   ;;  %vm1086_vm0 = vmmov 0   ;;  %v1087_v1 = vmov 0.0   ;;  %v313_v2 = vld [vmem:[#allocation6] sm:$0xff] }
  0x6d   : > { %770 = vmatprep.subr.bf16.mxu0 %v1085_v0  ;;  %732 = vmatprep.mubr.msk.f32.mxu0 %vm1086_vm0, %v1087_v1  ;;  %v314_v3 = vld [vmem:[#allocation6 + $0x8] sm:$0xff]  ;;  %v315_v4 = vld [vmem:[#allocation6 + $0x10] sm:$0xff]  ;;  %v316_v6 = vld [vmem:[#allocation6 + $0x18] sm:$0xff]  ;;  %s663_s7 = sshll.u32 %s1070_s21, 7  ;;  %s307_s9 = scalar_lea.vmem [#allocation9], %s656_s25 }
  0x6e   : > { %794 = vmatprep.subr.bf16.mxu1 %v1085_v0  ;;  %767 = vmatprep.mubr.msk.f32.mxu1 %vm1086_vm0, %v1087_v1  ;;  %v771_v5 = vpack.c.bf16 %v314_v3, %v313_v2  ;;  %v774_v7 = vpack.c.bf16 %v316_v6, %v315_v4  ;;  %v317_v8 = vld [vmem:[#allocation6 + $0x20] sm:$0xff]  ;;  %v318_v9 = vld [vmem:[#allocation6 + $0x28] sm:$0xff]  ;;  %v409_v12 = vld [vmem:[#allocation8 + $0x10] sm:$0xff]  ;;  %s533_s11 = sshll.u32 %s307_s9, 4  ;;  %s1349_s14 = scalar_lea.hbm %s1403_s5, %s663_s7  ;;  %s1351_s11 = int_to_ptr.vmem [resolvable:$true] %s533_s11 }
  0x6f   : > { %v407_v10 = vld [vmem:[#allocation8] sm:$0xff]  ;;  %v408_v11 = vld [vmem:[#allocation8 + $0x8] sm:$0xff]  ;;  %v410_v13 = vld [vmem:[#allocation8 + $0x18] sm:$0xff]  ;;  %v777_v14 = vpack.c.bf16 %v318_v9, %v317_v8  ;;  %s520_s10 = scalar_lea.sflag [#allocation5], %s1304_s13  ;;  %s992_s16 = scalar_lea.vmem %s1351_s11, 128 }
  0x70   : > { %772 = vmatpush3.bf16.msra.mxu0 %v771_v5  ;;  %v795_v15 = vpack.c.bf16 %v408_v11, %v407_v10  ;;  %v319_v16 = vld [vmem:[#allocation6 + $0x30] sm:$0xff]  ;;  %v320_v17 = vld [vmem:[#allocation6 + $0x38] sm:$0xff]  ;;  %v798_v18 = vpack.c.bf16 %v410_v13, %v409_v12  ;;  %v411_v19 = vld [vmem:[#allocation8 + $0x20] sm:$0xff]  ;;  %p993_p8 = scmp.ne.s32.totalorder %s1351_s11, %s992_s16  ;;  %p1418_p12 = scmp.ne.s32.totalorder %s1414_s8, 0 }
  0x71   : > { %773 = vmatprep.subr.bf16.mxu0 %v1085_v0  ;;  %v412_v20 = vld [vmem:[#allocation8 + $0x28] sm:$0xff]  ;;  %v780_v21 = vpack.c.bf16 %v320_v17, %v319_v16  ;;  %v321_v22 = vld [vmem:[#allocation6 + $0x40] sm:$0xff]  ;;  %v413_v25 = vld [vmem:[#allocation8 + $0x30] sm:$0xff]  ;;  %s1088_s21 = smov [#allocation9]  }
  0x72   : > { %796 = vmatpush3.bf16.msra.mxu1 %v795_v15  ;;  %v322_v23 = vld [vmem:[#allocation6 + $0x48] sm:$0xff]  ;;  %v801_v24 = vpack.c.bf16 %v412_v20, %v411_v19  ;;  %v414_v26 = vld [vmem:[#allocation8 + $0x38] sm:$0xff]  ;;  %v323_v28 = vld [vmem:[#allocation6 + $0x50] sm:$0xff]  ;;  %p994_p1 = pnand %p993_p8, %p1418_p12  ;;  %s996_s25 = sshll.u32 %s1088_s21, 4  ;;  %s997_s25 = int_to_ptr.vmem [resolvable:$false] %s996_s25 }
  0x73   : > { %797 = vmatprep.subr.bf16.mxu1 %v1085_v0  ;;  %v783_v27 = vpack.c.bf16 %v322_v23, %v321_v22  ;;  %v324_v29 = vld [vmem:[#allocation6 + $0x58] sm:$0xff]  ;;  %v804_v30 = vpack.c.bf16 %v414_v26, %v413_v25  ;;  %v415_v31 = vld [vmem:[#allocation8 + $0x40] sm:$0xff]  ;;  %v416_v32 = vld [vmem:[#allocation8 + $0x48] sm:$0xff]  ;;  %p999_p3 = scmp.lt.s32.totalorder %s1351_s11, %s997_s25 }
  0x74   : > { %775 = vmatpush3.bf16.msra.mxu0 %v774_v7  ;;  %v786_v33 = vpack.c.bf16 %v324_v29, %v323_v28  ;;  %v325_v34 = vld [vmem:[#allocation6 + $0x60] sm:$0xff]  ;;  %v326_v35 = vld [vmem:[#allocation6 + $0x68] sm:$0xff]  ;;  %v807_v36 = vpack.c.bf16 %v416_v32, %v415_v31  ;;  %v417_v37 = vld [vmem:[#allocation8 + $0x50] sm:$0xff]  ;;  %p995_p10 = pneg %p994_p1 }
  0x75   : > { %776 = vmatprep.subr.bf16.mxu0 %v1085_v0  ;;  %v418_v38 = vld [vmem:[#allocation8 + $0x58] sm:$0xff]  ;;  %v789_v39 = vpack.c.bf16 %v326_v35, %v325_v34  ;;  %v327_v40 = vld [vmem:[#allocation6 + $0x70] sm:$0xff]  ;;  %v419_v43 = vld [vmem:[#allocation8 + $0x60] sm:$0xff] }
  0x76   : > { %799 = vmatpush3.bf16.msra.mxu1 %v798_v18  ;;  %v328_v41 = vld [vmem:[#allocation6 + $0x78] sm:$0xff]  ;;  %v810_v42 = vpack.c.bf16 %v418_v38, %v417_v37  ;;  %v420_v44 = vld [vmem:[#allocation8 + $0x68] sm:$0xff]  ;;  %v421_v48 = vld [vmem:[#allocation8 + $0x70] sm:$0xff] }
  0x77   : > { %800 = vmatprep.subr.bf16.mxu1 %v1085_v0  ;;  %v792_v45 = vpack.c.bf16 %v328_v41, %v327_v40  ;;  %v813_v46 = vpack.c.bf16 %v420_v44, %v419_v43  ;;  %v312_v47 = vld [vmem:[%s1310_s17] sm:$0xff]  ;;  %s998_s17 = scalar_lea.vmem %s997_s25, 256 }
  0x78   : > { %778 = vmatpush3.bf16.msra.mxu0 %v777_v14  ;;  %v422_v49 = vld [vmem:[#allocation8 + $0x78] sm:$0xff]  ;;  %v660_v51 = vld [vmem:[%s1400_s2] ss:$0 sm:$0xff]  ;;  %p1000_p5 = scmp.lt.s32.totalorder %s998_s17, %s992_s16 }
  0x79   : > { %779 = vmatprep.subr.bf16.mxu0 %v1085_v0  ;;  %v816_v50 = vpack.c.bf16 %v422_v49, %v421_v48  ;;  %v661_v56 = vld [vmem:[%s1402_s4] ss:$0 sm:$0xff] }
  0x7a   : > { %802 = vmatpush3.bf16.msra.mxu1 %v801_v24  ;;  %p1001_p9 = por %p1000_p5, %p999_p3 }
  0x7b   : > { %803 = vmatprep.subr.bf16.mxu1 %v1085_v0 }
  0x7c   : > { %781 = vmatpush3.bf16.msra.mxu0 %v780_v21  ;;  %p1002_p11 = pnand %p1001_p9, %p995_p10 }
  0x7d   : > { %782 = vmatprep.subr.bf16.mxu0 %v1085_v0 }
  0x7e   : > { %805 = vmatpush3.bf16.msra.mxu1 %v804_v30 }
  0x7f   : > { %806 = vmatprep.subr.bf16.mxu1 %v1085_v0 }
  0x80   : > { %784 = vmatpush3.bf16.msra.mxu0 %v783_v27 }
  0x81   : > { %785 = vmatprep.subr.bf16.mxu0 %v1085_v0 }
  0x82   : > { %808 = vmatpush3.bf16.msra.mxu1 %v807_v36 }
  0x83   : > { %809 = vmatprep.subr.bf16.mxu1 %v1085_v0 }
  0x84   : > { %787 = vmatpush3.bf16.msra.mxu0 %v786_v33 }
  0x85   : > { %788 = vmatprep.subr.bf16.mxu0 %v1085_v0 }
  0x86   : > { %811 = vmatpush3.bf16.msra.mxu1 %v810_v42 }
  0x87   : > { %812 = vmatprep.subr.bf16.mxu1 %v1085_v0 }
  0x88   : > { %790 = vmatpush3.bf16.msra.mxu0 %v789_v39 }
  0x89   : > { %791 = vmatprep.subr.bf16.mxu0 %v1085_v0 }
  0x8a   : > { %814 = vmatpush3.bf16.msra.mxu1 %v813_v46 }
  0x8b   : > { %815 = vmatprep.subr.bf16.mxu1 %v1085_v0 }
  0x8c   : > { %793 = vmatpush3.bf16.msra.mxu0 %v792_v45 }
  0x8e   : > { %817 = vmatpush3.bf16.msra.mxu1 %v816_v50 }
  0x8f   : > { %733 = vmatmul.mubr.f32.vlgmr.msra.gmra.mrb[0].mxu0 %v312_v47 }
 0x162   : > { %v402_v52 = vpop.f32.mrb[0].mxu0 }
 0x163   : > { %v403_v53 = vadd.f32 %v660_v51, %v402_v52  ;;  %v734_v54 = vpop.f32.mrb[1].mxu0 }
 0x165   : > { %v406_v55 = vmax.f32 %v403_v53, 0.0 }
 0x167   : > { %768 = vmatmul.mubr.f32.vlgmr.msra.gmra.mrb[0].mxu1 %v406_v55 }
 0x23a   : > { %v489_v57 = vpop.f32.mrb[0].mxu1 }
 0x23b   : > { %v517_v58 = vadd.f32 %v661_v56, %v489_v57  ;;  %v769_v59 = vpop.f32.mrb[1].mxu1 }
 0x23d   : > { %518 = vst [vmem:[%s307_s9] sm:$0xff] %v517_v58 }
 0x23e   : > { %1005 = shalt.err (!%p1002_p11)
}
 0x23f   : > { %s1006_s13 = scalar_lea.hbm %s1349_s14, 128  ;;  %s1010_s30 = scalar_lea.hbm %s1403_s5, 256 }
 0x240   : > { %p1007_p0 = scmp.ne.s32.totalorder %s1349_s14, %s1006_s13  ;;  %p1011_p6 = scmp.lt.u32.totalorder %s1349_s14, %s1403_s5 }
 0x241   : > { %p1012_p7 = scmp.lt.u32.totalorder %s1010_s30, %s1006_s13  ;;  %p1014_p8 = scmp.lt.u32.totalorder %s1006_s13, %s1349_s14 }
 0x242   : > { %p1008_p4 = pnand %p1007_p0, %p1418_p12 }
 0x243   : > { %p1013_p2 = por %p1012_p7, %p1011_p6 }
 0x244   : > { %p1009_p13 = pneg %p1008_p4 }
 0x245   : > { %p1015_p1 = por %p1014_p8, %p1013_p2 }
 0x247   : > { %p1016_p10 = pnand %p1015_p1, %p1009_p13 }
 0x249   : > { %1019 = shalt.err (!%p1016_p10)
}
 0x24a   : > { %828 = dma.vmem_to_hbm [thread:$0]  (%p1418_p12), %s1351_s11, 128, %s1349_s14, %s520_s10  }
 0x24b PF: > { %s545_s9 = sand.u32 1, %s1058_s18   ;;  %p1419_p3 = scmp.ne.s32.totalorder %s1411_s29, 0 }
 0x24c   : > { %p1420_p5 = scmp.ge.s32.totalorder %s1078_s23, 2  ;;  %s546_s15 = scalar_lea.sflag [#allocation5], %s545_s9 }
 0x24e   : > { %p842_p9 = pnand %p1420_p5, %p1419_p3 }
 0x250   : > { %1053 = dma.done.wait (!%p842_p9), %s546_s15, 128  }
 0x251   : > { %1055 = vsyncadd (!%p842_p9), %s546_s15, 4294967168  ;;  %s22_s23 = sadd.s32 1, %s1078_s23   ;;  %s1421_s18 = smov %s1062_s19 }
 0x252   : > { %p19_p11 = scmp.ge.s32.totalorder %s22_s23, 4   ;;  %s1422_s19 = smov %s1066_s20 }
 0x253   : > { %s1423_s20 = smov %s1261_s6  ;;  %s1424_s21 = smov %s1074_s22 }
 0x254   : > { %s1425_s22 = smov %s1427_s12  ;;  %21 = sbr.rel (!%p19_p11) target bundleno = 7 (0x7), region = 110 }
 0x25b   :  { %551 = vsyncpa [#allocation4], 1 }
 0x25c   :  { %553 = vsyncpa [#allocation4 + $0x1], 1 }
 0x25d   :  { %554 = vsyncpa [#allocation7], 1 }
 0x25e   :  { %555 = vsyncpa [#allocation5], 1 }
 0x25f   :  { %557 = vsyncpa [#allocation5 + $0x1], 1 }

</bundles_post_ra>
